<compile_context>
chip_gen: v6e
topology: v6e:2x2x1
jax: 0.10.0
libtpu: 0.0.40
codegen_flags: <defaults>
</compile_context>

<pallas_src>
import jax
import jax.numpy as jnp
from jax.experimental import pallas as pl
from jax.experimental.pallas import tpu as pltpu

NEG_SLOPE = 0.01   # PyTorch nn.LeakyReLU default negative_slope
LANE = 128         # TPU lane width


def _leaky_relu(x):
    return jnp.where(x > 0, x, NEG_SLOPE * x)


def _round_up(n, m):
    return (n + m - 1) // m * m


def _cdiv(a, b):
    return (a + b - 1) // b


def _pad2(a, rows, cols):
    r, c = a.shape
    if (r, c) == (rows, cols):
        return a
    return jnp.pad(a, ((0, rows - r), (0, cols - c)))


def _vmem_budget_bytes():
    """Per-generation VMEM budget: ~85% of physical, leaving headroom for compiler
    scratch/semaphores. ~54 MiB on v7x (64 MiB), ~108 MiB on v5e/v6e (128 MiB)."""
    try:
        cap = int(pltpu.get_tpu_info().vmem_capacity_bytes)
    except Exception:
        cap = 64 * 1024 * 1024      # conservative fallback: assume v7x-sized VMEM
    return int(cap * 0.85)


def mlp_kernel(x_ref, w1_ref, b1_ref, w2_ref, b2_ref, w3_ref, b3_ref, o_ref):
    x = x_ref[...]                                                     # (tile_m, Din_p)
    h1 = jnp.dot(x, w1_ref[...], preferred_element_type=jnp.float32) + b1_ref[...]
    h1 = _leaky_relu(h1).astype(w2_ref.dtype)
    h2 = jnp.dot(h1, w2_ref[...], preferred_element_type=jnp.float32) + b2_ref[...]
    h2 = _leaky_relu(h2).astype(w3_ref.dtype)
    out = jnp.dot(h2, w3_ref[...], preferred_element_type=jnp.float32) + b3_ref[...]
    o_ref[...] = out.astype(o_ref.dtype)


def prepare_params(params, *, compute_dtype=jnp.bfloat16):
    """One-time weight prep (call once, reuse across forwards): zero-pad every
    weight/bias to lane-dense (multiple-of-128) shapes and cast MXU inputs to
    compute_dtype. Biases stay f32 (added to the f32 MXU accumulator in-kernel)."""
    w1, b1 = params["w1"], params["b1"]
    w2, b2 = params["w2"], params["b2"]
    w3, b3 = params["w3"], params["b3"]

    Din, H1 = w1.shape
    H2, Dout = w2.shape[1], w3.shape[1]
    Din_p, H1_p = _round_up(Din, LANE), _round_up(H1, LANE)
    H2_p, Dout_p = _round_up(H2, LANE), _round_up(Dout, LANE)

    return {
        "w1": _pad2(w1.astype(compute_dtype), Din_p, H1_p),
        "w2": _pad2(w2.astype(compute_dtype), H1_p, H2_p),
        "w3": _pad2(w3.astype(compute_dtype), H2_p, Dout_p),
        "b1": _pad2(b1.astype(jnp.float32), 1, H1_p),
        "b2": _pad2(b2.astype(jnp.float32), 1, H2_p),
        "b3": _pad2(b3.astype(jnp.float32), 1, Dout_p),
        "dims": (Din, H1, H2, Dout),
        "compute_dtype": jnp.dtype(compute_dtype),
    }


def mlp_forward(x, prepared, *, out_dtype=None, tile_m=None):
    """x: (B, input_dim). prepared: output of prepare_params()."""
    Din, H1, H2, Dout = prepared["dims"]
    compute_dtype = prepared["compute_dtype"]
    w1, b1 = prepared["w1"], prepared["b1"]
    w2, b2 = prepared["w2"], prepared["b2"]
    w3, b3 = prepared["w3"], prepared["b3"]
    Din_p, H1_p = w1.shape
    H2_p, Dout_p = w2.shape[1], w3.shape[1]

    B = x.shape[0]
    assert x.shape[1] == Din, (x.shape, Din)
    if out_dtype is None:
        out_dtype = x.dtype

    vmem_budget = _vmem_budget_bytes()
    # Bigger batch tiles amortize the ~0.35us/step overhead; allow 512-row tiles on
    # 128-MiB-VMEM parts (v5e/v6e), 256 on v7x.
    max_tile = 512 if vmem_budget >= 80 * 1024 * 1024 else 256

    if tile_m is None:
        n_tiles = max(1, _cdiv(B, max_tile))
        if B >= 32:
            n_tiles = max(n_tiles, 2)       # >=2 grid steps so v7x's 2 TCs both get work
        # Balanced tiles, multiple of 16 (bf16 sublane pair): pad waste < 16 rows/tile.
        tile_m = _round_up(_cdiv(B, n_tiles), 16)
    else:
        tile_m = _round_up(tile_m, 16)
    grid = (_cdiv(B, tile_m),)
    B_p = grid[0] * tile_m

    # Per-call activation prep only (weights were prepared once); no-ops when x is
    # already lane-dense and in compute_dtype.
    x_c = x if x.dtype == compute_dtype else x.astype(compute_dtype)
    x_p = _pad2(x_c, B_p, Din_p)

    # Footprint: double-buffered x/out tiles + single-buffered resident weights/biases
    # + f32 intermediates; 2x headroom, capped by the per-generation budget.
    w_itemsize = jnp.dtype(compute_dtype).itemsize
    out_itemsize = jnp.dtype(out_dtype).itemsize
    footprint = (
        2 * tile_m * Din_p * w_itemsize
        + 2 * tile_m * Dout_p * out_itemsize
        + w_itemsize * (Din_p * H1_p + H1_p * H2_p + H2_p * Dout_p)
        + 4 * (H1_p + H2_p + Dout_p)
        + 3 * tile_m * max(H1_p, H2_p, Dout_p) * 4
    )
    vmem_limit = int(min(max(2 * footprint, 32 * 1024 * 1024), vmem_budget))

    # Grid-invariant (weight/bias) blocks: same block every step -> single-buffered.
    def const(shape):
        return pl.BlockSpec(shape, lambda i: (0,) * len(shape),
                            pipeline_mode=pl.Buffered(1))

    out_p = pl.pallas_call(
        mlp_kernel,
        out_shape=jax.ShapeDtypeStruct((B_p, Dout_p), out_dtype),
        grid_spec=pltpu.PrefetchScalarGridSpec(
            num_scalar_prefetch=0,
            grid=grid,
            in_specs=[
                pl.BlockSpec((tile_m, Din_p), lambda i: (i, 0)),   # x tile (double-buffered)
                const((Din_p, H1_p)), const((1, H1_p)),
                const((H1_p, H2_p)), const((1, H2_p)),
                const((H2_p, Dout_p)), const((1, Dout_p)),
            ],
            out_specs=pl.BlockSpec((tile_m, Dout_p), lambda i: (i, 0)),
        ),
        compiler_params=pltpu.CompilerParams(
            dimension_semantics=("parallel",),
            vmem_limit_bytes=vmem_limit,
        ),
    )(x_p, w1, b1, w2, b2, w3, b3)

    if (B_p, Dout_p) == (B, Dout):
        return out_p
    return out_p[:B, :Dout]


def init_params(key, input_dim, hid1, hid2, output_dim):
    """Mirror the PyTorch module's init (kaiming_normal_ weights, default Linear bias).
    torch Linear weight is (out, in); we store the transpose (in, out)."""
    ks = jax.random.split(key, 6)

    def kaiming(k, fan_in, fan_out):
        std = (2.0 / fan_in) ** 0.5
        w = std * jax.random.normal(k, (fan_out, fan_in), dtype=jnp.float32)
        return w.T

    def bias(k, fan_in, fan_out):
        bound = 1.0 / (fan_in ** 0.5)
        return jax.random.uniform(k, (1, fan_out), dtype=jnp.float32,
                                  minval=-bound, maxval=bound)

    return {
        "w1": kaiming(ks[0], input_dim, hid1),  "b1": bias(ks[1], input_dim, hid1),
        "w2": kaiming(ks[2], hid1, hid2),       "b2": bias(ks[3], hid1, hid2),
        "w3": kaiming(ks[4], hid2, output_dim), "b3": bias(ks[5], hid2, output_dim),
    }


def mlp_reference(x, p):
    h1 = _leaky_relu(x @ p["w1"] + p["b1"])
    h2 = _leaky_relu(h1 @ p["w2"] + p["b2"])
    return h2 @ p["w3"] + p["b3"]


if __name__ == "__main__":
    key = jax.random.PRNGKey(0)
    k_x, k_x2, k_p = jax.random.split(key, 3)

    B, input_dim, hid1, hid2, output_dim = 16, 32, 64, 64, 16
    x = jax.random.normal(k_x, (B, input_dim), dtype=jnp.float32)
    params = init_params(k_p, input_dim, hid1, hid2, output_dim)
    ref = mlp_reference(x, params)

    # Exact f32 path (tight tolerance).
    prep_f32 = prepare_params(params, compute_dtype=jnp.float32)
    out_f32 = jax.block_until_ready(mlp_forward(x, prep_f32))
    assert out_f32.shape == (B, output_dim)
    assert jnp.allclose(out_f32, ref, atol=1e-4, rtol=1e-4)

    # Default fast path: bf16 MXU inputs, f32 accumulation. Params prepared ONCE
    # and reused across calls (no per-call weight pad/cast HBM passes).
    prep_bf16 = prepare_params(params)
    out_bf16 = jax.block_until_ready(mlp_forward(x, prep_bf16))
    assert out_bf16.shape == (B, output_dim)
    assert jnp.allclose(out_bf16, ref, atol=5e-2, rtol=5e-2)

    # Larger, non-tile-aligned batch: exercises the balanced multi-tile path
    # (2 grid steps, tile_m multiple of 16, pad waste < 16 rows per tile).
    B2 = 300
    x2 = jax.random.normal(k_x2, (B2, input_dim), dtype=jnp.float32)
    ref2 = mlp_reference(x2, params)
    out2 = jax.block_until_ready(mlp_forward(x2, prep_bf16))
    assert out2.shape == (B2, output_dim)
    assert jnp.allclose(out2, ref2, atol=5e-2, rtol=5e-2)

    print("KERNEL_OK")
</pallas_src>

<mosaic_0001>
module attributes {stable_mosaic.version = 11 : i64} {
  func.func @mlp_kernel(%arg0: i32, %arg1: memref<16x128xf32, #tpu.memory_space<vmem>>, %arg2: memref<128x128xf32, #tpu.memory_space<vmem>>, %arg3: memref<1x128xf32, #tpu.memory_space<vmem>>, %arg4: memref<128x128xf32, #tpu.memory_space<vmem>>, %arg5: memref<1x128xf32, #tpu.memory_space<vmem>>, %arg6: memref<128x128xf32, #tpu.memory_space<vmem>>, %arg7: memref<1x128xf32, #tpu.memory_space<vmem>>, %arg8: memref<16x128xf32, #tpu.memory_space<vmem>>) attributes {dimension_semantics = [#tpu.dimension_semantics<parallel>], iteration_bounds = array<i64: 1>, scalar_prefetch = 0 : i64, scratch_operands = 0 : i64, tpu.core_type = #tpu.core_type<tc>, window_params = [{transform_indices = @transform_0, window_bounds = array<i64: 16, 128>}, {pipeline_mode = #tpu.pipeline_mode<synchronous>, transform_indices = @transform_1, window_bounds = array<i64: 128, 128>}, {pipeline_mode = #tpu.pipeline_mode<synchronous>, transform_indices = @transform_2, window_bounds = array<i64: 1, 128>}, {pipeline_mode = #tpu.pipeline_mode<synchronous>, transform_indices = @transform_3, window_bounds = array<i64: 128, 128>}, {pipeline_mode = #tpu.pipeline_mode<synchronous>, transform_indices = @transform_4, window_bounds = array<i64: 1, 128>}, {pipeline_mode = #tpu.pipeline_mode<synchronous>, transform_indices = @transform_5, window_bounds = array<i64: 128, 128>}, {pipeline_mode = #tpu.pipeline_mode<synchronous>, transform_indices = @transform_6, window_bounds = array<i64: 1, 128>}, {transform_indices = @transform_7, window_bounds = array<i64: 16, 128>}]} {
    %c0 = arith.constant 0 : index
    %c0_0 = arith.constant 0 : index
    %0 = vector.load %arg1[%c0, %c0_0] : memref<16x128xf32, #tpu.memory_space<vmem>>, vector<16x128xf32>
    %c0_1 = arith.constant 0 : index
    %c0_2 = arith.constant 0 : index
    %1 = vector.load %arg2[%c0_1, %c0_2] : memref<128x128xf32, #tpu.memory_space<vmem>>, vector<128x128xf32>
    %cst = arith.constant dense<0.000000e+00> : vector<16x128xf32>
    %2 = tpu.matmul %0, %1, %cst {dimension_numbers = #tpu.dot_dimension_numbers<[1], [0], [0], [1], [0, 0, 1, 1], [], []>} : vector<16x128xf32>, vector<128x128xf32>, vector<16x128xf32> -> vector<16x128xf32>
    %c0_3 = arith.constant 0 : index
    %c0_4 = arith.constant 0 : index
    %3 = vector.load %arg3[%c0_3, %c0_4] : memref<1x128xf32, #tpu.memory_space<vmem>>, vector<1x128xf32>
    %4 = vector.broadcast %3 : vector<1x128xf32> to vector<16x128xf32>
    %5 = arith.addf %2, %4 : vector<16x128xf32>
    %cst_5 = arith.constant 0.000000e+00 : f32
    %6 = vector.broadcast %cst_5 : f32 to vector<16x128xf32>
    %7 = arith.cmpf ogt, %5, %6 : vector<16x128xf32>
    %cst_6 = arith.constant 0.00999999977 : f32
    %8 = vector.broadcast %cst_6 : f32 to vector<16x128xf32>
    %9 = arith.mulf %8, %5 : vector<16x128xf32>
    %10 = arith.select %7, %5, %9 : vector<16x128xi1>, vector<16x128xf32>
    %c0_7 = arith.constant 0 : index
    %c0_8 = arith.constant 0 : index
    %11 = vector.load %arg4[%c0_7, %c0_8] : memref<128x128xf32, #tpu.memory_space<vmem>>, vector<128x128xf32>
    %cst_9 = arith.constant dense<0.000000e+00> : vector<16x128xf32>
    %12 = tpu.matmul %10, %11, %cst_9 {dimension_numbers = #tpu.dot_dimension_numbers<[1], [0], [0], [1], [0, 0, 1, 1], [], []>} : vector<16x128xf32>, vector<128x128xf32>, vector<16x128xf32> -> vector<16x128xf32>
    %c0_10 = arith.constant 0 : index
    %c0_11 = arith.constant 0 : index
    %13 = vector.load %arg5[%c0_10, %c0_11] : memref<1x128xf32, #tpu.memory_space<vmem>>, vector<1x128xf32>
    %14 = vector.broadcast %13 : vector<1x128xf32> to vector<16x128xf32>
    %15 = arith.addf %12, %14 : vector<16x128xf32>
    %cst_12 = arith.constant 0.000000e+00 : f32
    %16 = vector.broadcast %cst_12 : f32 to vector<16x128xf32>
    %17 = arith.cmpf ogt, %15, %16 : vector<16x128xf32>
    %cst_13 = arith.constant 0.00999999977 : f32
    %18 = vector.broadcast %cst_13 : f32 to vector<16x128xf32>
    %19 = arith.mulf %18, %15 : vector<16x128xf32>
    %20 = arith.select %17, %15, %19 : vector<16x128xi1>, vector<16x128xf32>
    %c0_14 = arith.constant 0 : index
    %c0_15 = arith.constant 0 : index
    %21 = vector.load %arg6[%c0_14, %c0_15] : memref<128x128xf32, #tpu.memory_space<vmem>>, vector<128x128xf32>
    %cst_16 = arith.constant dense<0.000000e+00> : vector<16x128xf32>
    %22 = tpu.matmul %20, %21, %cst_16 {dimension_numbers = #tpu.dot_dimension_numbers<[1], [0], [0], [1], [0, 0, 1, 1], [], []>} : vector<16x128xf32>, vector<128x128xf32>, vector<16x128xf32> -> vector<16x128xf32>
    %c0_17 = arith.constant 0 : index
    %c0_18 = arith.constant 0 : index
    %23 = vector.load %arg7[%c0_17, %c0_18] : memref<1x128xf32, #tpu.memory_space<vmem>>, vector<1x128xf32>
    %24 = vector.broadcast %23 : vector<1x128xf32> to vector<16x128xf32>
    %25 = arith.addf %22, %24 : vector<16x128xf32>
    %c0_19 = arith.constant 0 : index
    %c0_20 = arith.constant 0 : index
    %26 = vector.load %arg8[%c0_19, %c0_20] : memref<16x128xf32, #tpu.memory_space<vmem>>, vector<16x128xf32>
    tpu.vector_store %arg8[%c0_19, %c0_20], %25 {strides = array<i32>} : memref<16x128xf32, #tpu.memory_space<vmem>>, vector<16x128xf32>,
    return
  }
  func.func @transform_0(%arg0: i32) -> (i32, i32) {
    %c0_i32 = arith.constant 0 : i32
    %c0_i32_0 = arith.constant 0 : i32
    return %arg0, %c0_i32 : i32, i32
  }
  func.func @transform_1(%arg0: i32) -> (i32, i32) {
    %c0_i32 = arith.constant 0 : i32
    %c0_i32_0 = arith.constant 0 : i32
    %c0_i32_1 = arith.constant 0 : i32
    return %c0_i32, %c0_i32_0 : i32, i32
  }
  func.func @transform_2(%arg0: i32) -> (i32, i32) {
    %c0_i32 = arith.constant 0 : i32
    %c0_i32_0 = arith.constant 0 : i32
    %c0_i32_1 = arith.constant 0 : i32
    return %c0_i32, %c0_i32_0 : i32, i32
  }
  func.func @transform_3(%arg0: i32) -> (i32, i32) {
    %c0_i32 = arith.constant 0 : i32
    %c0_i32_0 = arith.constant 0 : i32
    %c0_i32_1 = arith.constant 0 : i32
    return %c0_i32, %c0_i32_0 : i32, i32
  }
  func.func @transform_4(%arg0: i32) -> (i32, i32) {
    %c0_i32 = arith.constant 0 : i32
    %c0_i32_0 = arith.constant 0 : i32
    %c0_i32_1 = arith.constant 0 : i32
    return %c0_i32, %c0_i32_0 : i32, i32
  }
  func.func @transform_5(%arg0: i32) -> (i32, i32) {
    %c0_i32 = arith.constant 0 : i32
    %c0_i32_0 = arith.constant 0 : i32
    %c0_i32_1 = arith.constant 0 : i32
    return %c0_i32, %c0_i32_0 : i32, i32
  }
  func.func @transform_6(%arg0: i32) -> (i32, i32) {
    %c0_i32 = arith.constant 0 : i32
    %c0_i32_0 = arith.constant 0 : i32
    %c0_i32_1 = arith.constant 0 : i32
    return %c0_i32, %c0_i32_0 : i32, i32
  }
  func.func @transform_7(%arg0: i32) -> (i32, i32) {
    %c0_i32 = arith.constant 0 : i32
    %c0_i32_0 = arith.constant 0 : i32
    return %arg0, %c0_i32 : i32, i32
  }
}

</mosaic_0001>

<bundles_post_ra>
// kernel: tpu_custom_call.1
= control target key start
LH: loop header
LB: loop body
LE: loop exit
PB: predicated region body
PF: predicated region fallthrough
CT: control target
= control target key end

     0   :  { %12 = vsyncpa [#allocation3], 0  ;;  %s774_s0 = inlined_call_operand.hbm [shape: f32[16,128], index: 0, kind: input, shape index: {}]   ;;  %s775_s1 = inlined_call_operand.hbm [shape: f32[128,128], index: 1, kind: input, shape index: {}]   ;;  %s776_s2 = inlined_call_operand.vmem [shape: f32[1,128], index: 2, kind: input, shape index: {}]   ;;  %s777_s3 = inlined_call_operand.hbm [shape: f32[128,128], index: 3, kind: input, shape index: {}]   ;;  %s778_s4 = inlined_call_operand.vmem [shape: f32[1,128], index: 4, kind: input, shape index: {}]   ;;  %s779_s5 = inlined_call_operand.hbm [shape: f32[128,128], index: 5, kind: input, shape index: {}]   ;;  %s780_s6 = inlined_call_operand.vmem [shape: f32[1,128], index: 6, kind: input, shape index: {}]   ;;  %s781_s7 = inlined_call_operand.hbm [shape: f32[16,128], index: 7, kind: output, shape index: {}]  }
   0x1   :  { %13 = vsyncpa [#allocation6], 0 }
   0x2   :  { %14 = vsyncpa [#allocation9], 0 }
   0x3   :  { %15 = vsyncpa [#allocation4], 0  ;;  %s688_s24 = smov [#allocation5]   ;;  %s689_s26 = smov [#allocation2]  }
   0x4   :  { %s33_s25 = sshll.u32 %s688_s24, 4  ;;  %s21_s27 = sshll.u32 %s689_s26, 4  ;;  %s34_s25 = int_to_ptr.vmem [resolvable:$true] %s33_s25  ;;  %s22_s27 = int_to_ptr.vmem [resolvable:$true] %s21_s27 }
   0x5   :  { %s588_s28 = scalar_lea.vmem %s34_s25, 2048  ;;  %p593_p1 = scmp.lt.s32.totalorder %s34_s25, %s34_s25 }
   0x6   :  { %p589_p0 = scmp.ne.s32.totalorder %s34_s25, %s588_s28  ;;  %p594_p2 = scmp.lt.s32.totalorder %s588_s28, %s588_s28 }
   0x8   :  { %p595_p3 = por %p594_p2, %p593_p1 }
   0xa   :  { %p596_p4 = pnand %p595_p3, %p589_p0 }
   0xc   :  { %599 = shalt.err (!%p596_p4)
}
   0xd   :  { %s690_s29 = smov 128   ;;  %s691_s30 = smov 8  }
   0xe   :  { %39 = dma.hbm_to_vmem [thread:$0]  %s775_s1, 2048, %s34_s25, [#allocation6], %s690_s29, %s690_s29, %s691_s30  }
   0xf   :  { %s608_s10 = scalar_lea.vmem %s22_s27, 256  ;;  %p613_p6 = scmp.lt.s32.totalorder %s22_s27, %s22_s27 }
  0x10   :  { %p609_p5 = scmp.ne.s32.totalorder %s22_s27, %s608_s10  ;;  %p614_p7 = scmp.lt.s32.totalorder %s608_s10, %s608_s10 }
  0x12   :  { %p615_p8 = por %p614_p7, %p613_p6 }
  0x14   :  { %p616_p9 = pnand %p615_p8, %p609_p5 }
  0x16   :  { %619 = shalt.err (!%p616_p9)
}
  0x17   :  { %27 = dma.hbm_to_vmem [thread:$0]  %s774_s0, 256, %s22_s27, [#allocation3], %s690_s29, %s690_s29, %s691_s30  }
  0x18   :  { %s692_s13 = smov [#allocation7]   ;;  %s693_s15 = smov [#allocation8]  }
  0x19   :  { %s47_s14 = sshll.u32 %s692_s13, 4  ;;  %s61_s16 = sshll.u32 %s693_s15, 4  ;;  %s48_s14 = int_to_ptr.vmem [resolvable:$true] %s47_s14  ;;  %s62_s16 = int_to_ptr.vmem [resolvable:$true] %s61_s16 }
  0x1a   :  { %s628_s1 = scalar_lea.vmem %s48_s14, 2048  ;;  %p633_p11 = scmp.lt.s32.totalorder %s48_s14, %s48_s14 }
  0x1b   :  { %p629_p10 = scmp.ne.s32.totalorder %s48_s14, %s628_s1  ;;  %p634_p12 = scmp.lt.s32.totalorder %s628_s1, %s628_s1 }
  0x1d   :  { %p635_p13 = por %p634_p12, %p633_p11 }
  0x1f   :  { %p636_p0 = pnand %p635_p13, %p629_p10 }
  0x21   :  { %639 = shalt.err (!%p636_p0)
}
  0x22   :  { %53 = dma.hbm_to_vmem [thread:$0]  %s777_s3, 2048, %s48_s14, [#allocation6], %s690_s29, %s690_s29, %s691_s30  }
  0x23   :  { %s648_s0 = scalar_lea.vmem %s62_s16, 2048  ;;  %p653_p2 = scmp.lt.s32.totalorder %s62_s16, %s62_s16 }
  0x24   :  { %p649_p1 = scmp.ne.s32.totalorder %s62_s16, %s648_s0  ;;  %p654_p3 = scmp.lt.s32.totalorder %s648_s0, %s648_s0 }
  0x26   :  { %p655_p4 = por %p654_p3, %p653_p2 }
  0x28   :  { %p656_p5 = pnand %p655_p4, %p649_p1 }
  0x2a   :  { %659 = shalt.err (!%p656_p5)
}
  0x2b   :  { %67 = dma.hbm_to_vmem [thread:$0]  %s779_s5, 2048, %s62_s16, [#allocation9], %s690_s29, %s690_s29, %s691_s30  }
  0x2c   :  { %680 = dma.done.wait [#allocation3], 256  }
  0x2d   :  { %681 = vsyncadd [#allocation3], 4294967040 }
  0x2e   :  { %682 = dma.done.wait [#allocation6], 4096  }
  0x2f   :  { %683 = vsyncadd [#allocation6], 4294963200 }
  0x30   :  { %684 = dma.done.wait [#allocation9], 2048  }
  0x31   :  { %685 = vsyncadd [#allocation9], 4294965248  ;;  %v99_v0 = vld [vmem:[#allocation5 + $0x78] sm:$0xff]  ;;  %v98_v1 = vld [vmem:[#allocation5 + $0x70] sm:$0xff]  ;;  %s694_s24 = smov [#allocation10]  }
  0x32   :  { %468 = vmatprep.subr.mxu0 %v99_v0  ;;  %v97_v2 = vld [vmem:[#allocation5 + $0x68] sm:$0xff]  ;;  %v96_v3 = vld [vmem:[#allocation5 + $0x60] sm:$0xff]  ;;  %v82_v4 = vld [vmem:[#allocation2] sm:$0xff]  ;;  %s397_s25 = sshll.u32 %s694_s24, 4  ;;  %s398_s25 = int_to_ptr.vmem [resolvable:$true] %s397_s25 }
  0x33   :  { %469 = vmatpush3.msra.mxu0 %v99_v0  ;;  %v95_v5 = vld [vmem:[#allocation5 + $0x58] sm:$0xff]  ;;  %500 = vmatprep.mubr.f32.mxu0 %v82_v4  ;;  %v202_v7 = vld [vmem:[#allocation7 + $0x70] sm:$0xff]  ;;  %v201_v9 = vld [vmem:[#allocation7 + $0x68] sm:$0xff]  ;;  %p665_p7 = scmp.lt.s32.totalorder %s398_s25, %s398_s25 }
  0x34   :  { %470 = vmatprep.subr.mxu0 %v98_v1  ;;  %v203_v6 = vld [vmem:[#allocation7 + $0x78] sm:$0xff]  ;;  %v94_v8 = vld [vmem:[#allocation5 + $0x50] sm:$0xff]  ;;  %v93_v10 = vld [vmem:[#allocation5 + $0x48] sm:$0xff] }
  0x35   :  { %471 = vmatpush3.msra.mxu0 %v98_v1  ;;  %503 = vmatprep.subr.mxu1 %v203_v6  ;;  %v200_v11 = vld [vmem:[#allocation7 + $0x60] sm:$0xff]  ;;  %v199_v13 = vld [vmem:[#allocation7 + $0x58] sm:$0xff]  ;;  %v198_v15 = vld [vmem:[#allocation7 + $0x50] sm:$0xff] }
  0x36   :  { %472 = vmatprep.subr.mxu0 %v97_v2  ;;  %504 = vmatpush3.msra.mxu1 %v203_v6  ;;  %v92_v12 = vld [vmem:[#allocation5 + $0x40] sm:$0xff]  ;;  %v91_v14 = vld [vmem:[#allocation5 + $0x38] sm:$0xff]  ;;  %v90_v16 = vld [vmem:[#allocation5 + $0x30] sm:$0xff] }
  0x37   :  { %473 = vmatpush3.msra.mxu0 %v97_v2  ;;  %505 = vmatprep.subr.mxu1 %v202_v7  ;;  %v197_v17 = vld [vmem:[#allocation7 + $0x48] sm:$0xff]  ;;  %v196_v19 = vld [vmem:[#allocation7 + $0x40] sm:$0xff]  ;;  %v195_v21 = vld [vmem:[#allocation7 + $0x38] sm:$0xff] }
  0x38   :  { %474 = vmatprep.subr.mxu0 %v96_v3  ;;  %506 = vmatpush3.msra.mxu1 %v202_v7  ;;  %v89_v18 = vld [vmem:[#allocation5 + $0x28] sm:$0xff]  ;;  %v88_v20 = vld [vmem:[#allocation5 + $0x20] sm:$0xff]  ;;  %v87_v22 = vld [vmem:[#allocation5 + $0x18] sm:$0xff] }
  0x39   :  { %475 = vmatpush3.msra.mxu0 %v96_v3  ;;  %507 = vmatprep.subr.mxu1 %v201_v9  ;;  %v194_v23 = vld [vmem:[#allocation7 + $0x30] sm:$0xff]  ;;  %v193_v25 = vld [vmem:[#allocation7 + $0x28] sm:$0xff]  ;;  %v192_v27 = vld [vmem:[#allocation7 + $0x20] sm:$0xff] }
  0x3a   :  { %476 = vmatprep.subr.mxu0 %v95_v5  ;;  %508 = vmatpush3.msra.mxu1 %v201_v9  ;;  %v86_v24 = vld [vmem:[#allocation5 + $0x10] sm:$0xff]  ;;  %v85_v26 = vld [vmem:[#allocation5 + $0x8] sm:$0xff]  ;;  %v84_v28 = vld [vmem:[#allocation5] sm:$0xff] }
  0x3b   :  { %477 = vmatpush3.msra.mxu0 %v95_v5  ;;  %509 = vmatprep.subr.mxu1 %v200_v11  ;;  %v83_v29 = vld [vmem:[#allocation2 + $0x8] sm:$0xff]  ;;  %v190_v31 = vld [vmem:[#allocation7 + $0x10] sm:$0xff]  ;;  %v189_v32 = vld [vmem:[#allocation7 + $0x8] sm:$0xff] }
  0x3c   :  { %478 = vmatprep.subr.mxu0 %v94_v8  ;;  %510 = vmatpush3.msra.mxu1 %v200_v11  ;;  %v191_v30 = vld [vmem:[#allocation7 + $0x18] sm:$0xff]  ;;  %v188_v33 = vld [vmem:[#allocation7] sm:$0xff]  ;;  %v306_v35 = vld [vmem:[#allocation8 + $0x70] sm:$0xff] }
  0x3d   :  { %479 = vmatpush3.msra.mxu0 %v94_v8  ;;  %511 = vmatprep.subr.mxu1 %v199_v13  ;;  %v307_v34 = vld [vmem:[#allocation8 + $0x78] sm:$0xff]  ;;  %v305_v36 = vld [vmem:[#allocation8 + $0x68] sm:$0xff]  ;;  %v304_v37 = vld [vmem:[#allocation8 + $0x60] sm:$0xff] }
  0x3e   :  { %480 = vmatprep.subr.mxu0 %v93_v10  ;;  %512 = vmatpush3.msra.mxu1 %v199_v13  ;;  %v303_v38 = vld [vmem:[#allocation8 + $0x58] sm:$0xff]  ;;  %v302_v39 = vld [vmem:[#allocation8 + $0x50] sm:$0xff]  ;;  %v301_v40 = vld [vmem:[#allocation8 + $0x48] sm:$0xff] }
  0x3f   :  { %481 = vmatpush3.msra.mxu0 %v93_v10  ;;  %513 = vmatprep.subr.mxu1 %v198_v15  ;;  %v300_v41 = vld [vmem:[#allocation8 + $0x40] sm:$0xff]  ;;  %v299_v42 = vld [vmem:[#allocation8 + $0x38] sm:$0xff]  ;;  %v298_v43 = vld [vmem:[#allocation8 + $0x30] sm:$0xff] }
  0x40   :  { %482 = vmatprep.subr.mxu0 %v92_v12  ;;  %514 = vmatpush3.msra.mxu1 %v198_v15  ;;  %v297_v44 = vld [vmem:[#allocation8 + $0x28] sm:$0xff]  ;;  %v296_v45 = vld [vmem:[#allocation8 + $0x20] sm:$0xff]  ;;  %v411_v46 = vld [vmem:[%s776_s2] ss:$0 sm:$0xff] }
  0x41   :  { %483 = vmatpush3.msra.mxu0 %v92_v12  ;;  %515 = vmatprep.subr.mxu1 %v197_v17  ;;  %v295_v55 = vld [vmem:[#allocation8 + $0x18] sm:$0xff]  ;;  %v294_v56 = vld [vmem:[#allocation8 + $0x10] sm:$0xff]  ;;  %v293_v57 = vld [vmem:[#allocation8 + $0x8] sm:$0xff] }
  0x42   :  { %484 = vmatprep.subr.mxu0 %v91_v14  ;;  %516 = vmatpush3.msra.mxu1 %v197_v17  ;;  %v292_v58 = vld [vmem:[#allocation8] sm:$0xff]  ;;  %v412_v59 = vld [vmem:[%s778_s4] ss:$0 sm:$0xff]  ;;  %s660_s4 = scalar_lea.vmem %s398_s25, 256 }
  0x43   :  { %485 = vmatpush3.msra.mxu0 %v91_v14  ;;  %517 = vmatprep.subr.mxu1 %v196_v19  ;;  %v413_v4 = vld [vmem:[%s780_s6] ss:$0 sm:$0xff]  ;;  %p661_p6 = scmp.ne.s32.totalorder %s398_s25, %s660_s4  ;;  %p666_p8 = scmp.lt.s32.totalorder %s660_s4, %s660_s4 }
  0x44   :  { %486 = vmatprep.subr.mxu0 %v90_v16  ;;  %518 = vmatpush3.msra.mxu1 %v196_v19 }
  0x45   :  { %487 = vmatpush3.msra.mxu0 %v90_v16  ;;  %519 = vmatprep.subr.mxu1 %v195_v21  ;;  %p667_p9 = por %p666_p8, %p665_p7 }
  0x46   :  { %488 = vmatprep.subr.mxu0 %v89_v18  ;;  %520 = vmatpush3.msra.mxu1 %v195_v21 }
  0x47   :  { %489 = vmatpush3.msra.mxu0 %v89_v18  ;;  %521 = vmatprep.subr.mxu1 %v194_v23  ;;  %p668_p10 = pnand %p667_p9, %p661_p6 }
  0x48   :  { %490 = vmatprep.subr.mxu0 %v88_v20  ;;  %522 = vmatpush3.msra.mxu1 %v194_v23 }
  0x49   :  { %491 = vmatpush3.msra.mxu0 %v88_v20  ;;  %523 = vmatprep.subr.mxu1 %v193_v25 }
  0x4a   :  { %492 = vmatprep.subr.mxu0 %v87_v22  ;;  %524 = vmatpush3.msra.mxu1 %v193_v25 }
  0x4b   :  { %493 = vmatpush3.msra.mxu0 %v87_v22  ;;  %525 = vmatprep.subr.mxu1 %v192_v27 }
  0x4c   :  { %494 = vmatprep.subr.mxu0 %v86_v24  ;;  %526 = vmatpush3.msra.mxu1 %v192_v27 }
  0x4d   :  { %495 = vmatpush3.msra.mxu0 %v86_v24  ;;  %527 = vmatprep.subr.mxu1 %v191_v30 }
  0x4e   :  { %496 = vmatprep.subr.mxu0 %v85_v26  ;;  %528 = vmatpush3.msra.mxu1 %v191_v30 }
  0x4f   :  { %497 = vmatpush3.msra.mxu0 %v85_v26  ;;  %529 = vmatprep.subr.mxu1 %v190_v31 }
  0x50   :  { %498 = vmatprep.subr.mxu0 %v84_v28  ;;  %530 = vmatpush3.msra.mxu1 %v190_v31 }
  0x51   :  { %499 = vmatpush3.msra.mxu0 %v84_v28  ;;  %531 = vmatprep.subr.mxu1 %v189_v32 }
  0x52   :  { %501 = vmatmul.mubr.f32.vlgmr.msra.gmra.mxu0 %v83_v29  ;;  %532 = vmatpush3.msra.mxu1 %v189_v32 }
  0x53   :  { %533 = vmatprep.subr.mxu1 %v188_v33  ;;  %538 = vmatprep.subr.mxu0 %v307_v34 }
  0x54   :  { %534 = vmatpush3.msra.mxu1 %v188_v33  ;;  %539 = vmatpush3.msra.mxu0 %v307_v34 }
  0x55   :  { %540 = vmatprep.subr.mxu0 %v306_v35 }
  0x56   :  { %541 = vmatpush3.msra.mxu0 %v306_v35 }
  0x57   :  { %542 = vmatprep.subr.mxu0 %v305_v36 }
  0x58   :  { %543 = vmatpush3.msra.mxu0 %v305_v36 }
  0x59   :  { %544 = vmatprep.subr.mxu0 %v304_v37 }
  0x5a   :  { %545 = vmatpush3.msra.mxu0 %v304_v37 }
  0x5b   :  { %546 = vmatprep.subr.mxu0 %v303_v38 }
  0x5c   :  { %547 = vmatpush3.msra.mxu0 %v303_v38 }
  0x5d   :  { %548 = vmatprep.subr.mxu0 %v302_v39 }
  0x5e   :  { %549 = vmatpush3.msra.mxu0 %v302_v39 }
  0x5f   :  { %550 = vmatprep.subr.mxu0 %v301_v40 }
  0x60   :  { %551 = vmatpush3.msra.mxu0 %v301_v40 }
  0x61   :  { %552 = vmatprep.subr.mxu0 %v300_v41 }
  0x62   :  { %553 = vmatpush3.msra.mxu0 %v300_v41 }
  0x63   :  { %554 = vmatprep.subr.mxu0 %v299_v42 }
  0x64   :  { %555 = vmatpush3.msra.mxu0 %v299_v42 }
  0x65   :  { %556 = vmatprep.subr.mxu0 %v298_v43 }
  0x66   :  { %557 = vmatpush3.msra.mxu0 %v298_v43 }
  0x67   :  { %558 = vmatprep.subr.mxu0 %v297_v44 }
  0x68   :  { %559 = vmatpush3.msra.mxu0 %v297_v44 }
  0x69   :  { %560 = vmatprep.subr.mxu0 %v296_v45 }
  0x6a   :  { %561 = vmatpush3.msra.mxu0 %v296_v45 }
  0x6b   :  { %562 = vmatprep.subr.mxu0 %v295_v55 }
  0x6c   :  { %563 = vmatpush3.msra.mxu0 %v295_v55 }
  0x6d   :  { %564 = vmatprep.subr.mxu0 %v294_v56 }
  0x6e   :  { %565 = vmatpush3.msra.mxu0 %v294_v56 }
  0x6f   :  { %566 = vmatprep.subr.mxu0 %v293_v57 }
  0x70   :  { %567 = vmatpush3.msra.mxu0 %v293_v57 }
  0x71   :  { %568 = vmatprep.subr.mxu0 %v292_v58 }
  0x72   :  { %569 = vmatpush3.msra.mxu0 %v292_v58 }
 0x112   :  { %v502_v47 = vpop.f32.mrf.mxu0 }
 0x113   :  { %v179_v48 = vadd.f32 %v502_v47, %v411_v46 }
 0x114   :  { %v173_v49 = vpop.f32.mrf.mxu0 }
 0x115   :  { %v174_v50 = vadd.f32 %v411_v46, %v173_v49  ;;  %v185_v51 = vmul.f32 0.01, %v179_v48  ;;  %vm183_vm1 = vcmp.gt.f32.partialorder %v179_v48, 0.0 }
 0x117   :  { %vm182_vm0 = vcmp.gt.f32.partialorder %v174_v50, 0.0  ;;  %v184_v52 = vmul.f32 0.01, %v174_v50  ;;  %v187_v54 = vsel %vm183_vm1, %v179_v48, %v185_v51 }
 0x119   :  { %v186_v53 = vsel %vm182_vm0, %v174_v50, %v184_v52 }
 0x11a   :  { %535 = vmatprep.mubr.f32.mxu1 %v186_v53 }
 0x11b   :  { %536 = vmatmul.mubr.f32.vlgmr.msra.gmra.mxu1 %v187_v54 }
 0x1db   :  { %v537_v60 = vpop.f32.mrf.mxu1 }
 0x1dc   :  { %v283_v61 = vadd.f32 %v537_v60, %v412_v59 }
 0x1dd   :  { %v277_v62 = vpop.f32.mrf.mxu1 }
 0x1de   :  { %v278_v63 = vadd.f32 %v412_v59, %v277_v62  ;;  %v289_v0 = vmul.f32 0.01, %v283_v61  ;;  %vm287_vm2 = vcmp.gt.f32.partialorder %v283_v61, 0.0 }
 0x1e0   :  { %v288_v1 = vmul.f32 0.01, %v278_v63  ;;  %vm286_vm3 = vcmp.gt.f32.partialorder %v278_v63, 0.0  ;;  %v291_v3 = vsel %vm287_vm2, %v283_v61, %v289_v0 }
 0x1e2   :  { %v290_v2 = vsel %vm286_vm3, %v278_v63, %v288_v1 }
 0x1e3   :  { %570 = vmatprep.mubr.f32.mxu0 %v290_v2 }
 0x1e4   :  { %571 = vmatmul.mubr.f32.vlgmr.msra.gmra.mxu0 %v291_v3 }
 0x2a4   :  { %v572_v5 = vpop.f32.mrf.mxu0 }
 0x2a5   :  { %v387_v6 = vadd.f32 %v572_v5, %v413_v4 }
 0x2a6   :  { %v381_v7 = vpop.f32.mrf.mxu0 }
 0x2a7   :  { %391 = vst [vmem:[#allocation10 + $0x8] sm:$0xff] %v387_v6  ;;  %v382_v8 = vadd.f32 %v413_v4, %v381_v7 }
 0x2a9   :  { %390 = vst [vmem:[#allocation10] sm:$0xff] %v382_v8 }
 0x2aa   :  { %671 = shalt.err (!%p668_p10)
}
 0x2ab   :  { %403 = dma.vmem_to_hbm [thread:$0]  %s398_s25, 256, %s781_s7, [#allocation4], %s690_s29, %s690_s29, %s691_s30  }
 0x2ac   :  { %686 = dma.done.wait [#allocation4], 256  }
 0x2ad   :  { %687 = vsyncadd [#allocation4], 4294967040 }
 0x2ae   :  { %407 = vsyncpa [#allocation3], 1 }
 0x2af   :  { %408 = vsyncpa [#allocation6], 1 }
 0x2b0   :  { %409 = vsyncpa [#allocation9], 1 }
 0x2b1   :  { %410 = vsyncpa [#allocation4], 1 }

</bundles_post_ra>
